<compile_context>
chip_gen: v7x
topology: tpu7x:2x2x1
jax: 0.10.0
libtpu: 0.0.40
codegen_flags: <defaults>
</compile_context>

<pallas_src>
import functools
import math

import jax
import jax.numpy as jnp
from jax.experimental import pallas as pl
from jax.experimental.pallas import tpu as pltpu


# --------------------------------------------------------------------------
# Fused decoder-step kernel
# --------------------------------------------------------------------------
def _decoder_kernel(ids_ref, emb_hbm_ref, w_ih_ref, w_hh_ref, b_ref,
                    fcw_ref, fcb_ref, h_in_ref, c_in_ref,
                    pred_ref, h_out_ref, c_out_ref,
                    x_buf, dma_sem,
                    *, num_layers, batch, emb_size, hidden_size, i_max):
    """Fused: embedding DMA-gather + num_layers LSTM cells + FC (padded out).

    ids_ref    : SMEM int32 [B]              token ids
    emb_hbm_ref: HBM  f32   [V, E]           embedding table (never fully copied)
    w_ih_ref   : VMEM f32   [L, I_max, 4H]   w_ih.T per layer (zero-padded rows)
    w_hh_ref   : VMEM f32   [L, H, 4H]       w_hh.T per layer
    b_ref      : VMEM f32   [L, 1, 4H]       b_ih + b_hh per layer
    fcw_ref    : VMEM f32   [H, O_pad]       fc weight (transposed, lane padded)
    fcb_ref    : VMEM f32   [1, O_pad]
    h/c in     : VMEM f32   [L, B, H]
    pred       : VMEM f32   [B, O_pad]
    h/c out    : VMEM f32   [L, B, H]
    x_buf      : VMEM f32   [B, E]           gathered embedding rows (scratch)
    dma_sem    : DMA sem    [B]
    """
    H = hidden_size

    # ---- embedding lookup: DMA only the B needed rows from HBM ----
    copies = []
    for b in range(batch):
        cp = pltpu.make_async_copy(
            emb_hbm_ref.at[pl.ds(ids_ref[b], 1), :],
            x_buf.at[pl.ds(b, 1), :],
            dma_sem.at[b])
        cp.start()
        copies.append(cp)
    for cp in copies:
        cp.wait()

    # TODO(synk): nn.Dropout / inter-layer LSTM dropout are identity here
    # (inference semantics); training-mode dropout masks not implemented.
    layer_in = x_buf[...]                           # [B, E]
    in_dim = emb_size

    for l in range(num_layers):                     # static unrolled layer loop
        if in_dim < i_max:                          # zero-pad feature dim
            pad = jnp.zeros((batch, i_max - in_dim), jnp.float32)
            layer_in = jnp.concatenate([layer_in, pad], axis=1)
        h_l = h_in_ref[l]                           # [B, H]
        c_l = c_in_ref[l]                           # [B, H]
        gates = (jnp.dot(layer_in, w_ih_ref[l],
                         preferred_element_type=jnp.float32)
                 + jnp.dot(h_l, w_hh_ref[l],
                           preferred_element_type=jnp.float32)
                 + b_ref[l])                                     # [B, 4H]
        # Whole-vreg EUP passes, then slice (PyTorch gate order i, f, g, o).
        sig = jax.nn.sigmoid(gates)
        tgh = jnp.tanh(gates)
        i_g = sig[:, 0 * H:1 * H]
        f_g = sig[:, 1 * H:2 * H]
        g_g = tgh[:, 2 * H:3 * H]
        o_g = sig[:, 3 * H:4 * H]
        c_new = f_g * c_l + i_g * g_g
        h_new = o_g * jnp.tanh(c_new)
        h_out_ref[l] = h_new
        c_out_ref[l] = c_new
        layer_in = h_new                            # stays in VMEM/vregs
        in_dim = H

    pred_ref[...] = (jnp.dot(layer_in, fcw_ref[...],
                             preferred_element_type=jnp.float32)
                     + fcb_ref[...])


def _full_spec(shape):
    # No grid -> index_map takes zero args; block == full array.
    return pl.BlockSpec(shape, lambda: (0,) * len(shape))


# --------------------------------------------------------------------------
# Parameter init (deterministic, PyTorch-like shapes)
# --------------------------------------------------------------------------
def init_decoder_params(key, input_size, embedding_size, hidden_size,
                        output_size, num_layers):
    k_lstm = 1.0 / math.sqrt(hidden_size)
    keys = jax.random.split(key, 3 + 4 * num_layers)
    params = {}
    params["embedding"] = jax.random.normal(
        keys[0], (input_size, embedding_size), jnp.float32)
    lstm = []
    for l in range(num_layers):
        in_sz = embedding_size if l == 0 else hidden_size
        kk = keys[3 + 4 * l: 3 + 4 * (l + 1)]
        lstm.append(dict(
            w_ih=jax.random.uniform(kk[0], (4 * hidden_size, in_sz),
                                    jnp.float32, -k_lstm, k_lstm),
            w_hh=jax.random.uniform(kk[1], (4 * hidden_size, hidden_size),
                                    jnp.float32, -k_lstm, k_lstm),
            b_ih=jax.random.uniform(kk[2], (4 * hidden_size,),
                                    jnp.float32, -k_lstm, k_lstm),
            b_hh=jax.random.uniform(kk[3], (4 * hidden_size,),
                                    jnp.float32, -k_lstm, k_lstm),
        ))
    params["lstm"] = lstm
    k_fc = 1.0 / math.sqrt(hidden_size)
    params["fc_w"] = jax.random.uniform(keys[1], (output_size, hidden_size),
                                        jnp.float32, -k_fc, k_fc)
    params["fc_b"] = jax.random.uniform(keys[2], (output_size,),
                                        jnp.float32, -k_fc, k_fc)
    return params


# --------------------------------------------------------------------------
# One-time weight layout prep (transposed, padded, stacked)
# --------------------------------------------------------------------------
def prepare_decoder_kernel_params(params):
    emb = params["embedding"]
    vocab, E = emb.shape
    lstm = params["lstm"]
    L = len(lstm)
    H = lstm[0]["w_hh"].shape[1]
    I_max = max(E, H)
    G = 4 * H

    w_ih_all = jnp.zeros((L, I_max, G), jnp.float32)
    w_hh_all = jnp.zeros((L, H, G), jnp.float32)
    b_all = jnp.zeros((L, 1, G), jnp.float32)
    for l, lw in enumerate(lstm):
        in_sz = lw["w_ih"].shape[1]
        w_ih_all = w_ih_all.at[l, :in_sz, :].set(lw["w_ih"].T)
        w_hh_all = w_hh_all.at[l].set(lw["w_hh"].T)
        b_all = b_all.at[l, 0, :].set(lw["b_ih"] + lw["b_hh"])

    O = params["fc_w"].shape[0]
    O_pad = max(128, ((O + 127) // 128) * 128)      # lane-dense FC output
    fc_w = jnp.zeros((H, O_pad), jnp.float32).at[:, :O].set(params["fc_w"].T)
    fc_b = jnp.zeros((1, O_pad), jnp.float32).at[0, :O].set(params["fc_b"])

    return dict(embedding=emb, w_ih_all=w_ih_all, w_hh_all=w_hh_all,
                b_all=b_all, fc_w=fc_w, fc_b=fc_b,
                dims=dict(L=L, H=H, E=E, I_max=I_max, O=O, O_pad=O_pad,
                          vocab=vocab))


# --------------------------------------------------------------------------
# Forward pass (matches Decoder.forward semantics; eval mode -> dropout = id)
# --------------------------------------------------------------------------
def decoder_forward(kparams, x, hidden, cell):
    """
    x:      [B] int32 token ids (PyTorch forward unsqueezes a seq dim of 1)
    hidden: [num_layers, B, H]
    cell:   [num_layers, B, H]
    returns (prediction [B, output_size], hidden, cell)
    """
    dims = kparams["dims"]
    L, H, E = dims["L"], dims["H"], dims["E"]
    I_max, O, O_pad = dims["I_max"], dims["O"], dims["O_pad"]
    B = x.shape[0]

    kernel = functools.partial(
        _decoder_kernel, num_layers=L, batch=B, emb_size=E,
        hidden_size=H, i_max=I_max)

    pred_pad, h_out, c_out = pl.pallas_call(
        kernel,
        out_shape=(jax.ShapeDtypeStruct((B, O_pad), jnp.float32),
                   jax.ShapeDtypeStruct((L, B, H), jnp.float32),
                   jax.ShapeDtypeStruct((L, B, H), jnp.float32)),
        in_specs=[
            pl.BlockSpec(memory_space=pltpu.MemorySpace.SMEM),   # token ids
            pl.BlockSpec(memory_space=pl.ANY),                   # emb table (HBM)
            _full_spec(kparams["w_ih_all"].shape),
            _full_spec(kparams["w_hh_all"].shape),
            _full_spec(kparams["b_all"].shape),
            _full_spec(kparams["fc_w"].shape),
            _full_spec(kparams["fc_b"].shape),
            _full_spec((L, B, H)),
            _full_spec((L, B, H)),
        ],
        out_specs=(_full_spec((B, O_pad)),
                   _full_spec((L, B, H)),
                   _full_spec((L, B, H))),
        scratch_shapes=[
            pltpu.VMEM((B, E), jnp.float32),        # gathered embedding rows
            pltpu.SemaphoreType.DMA((B,)),
        ],
    )(x.astype(jnp.int32), kparams["embedding"], kparams["w_ih_all"],
      kparams["w_hh_all"], kparams["b_all"], kparams["fc_w"], kparams["fc_b"],
      hidden, cell)

    return pred_pad[:, :O], h_out, c_out


# --------------------------------------------------------------------------
# Pure-jnp reference (same math, no Pallas) for a sanity check
# --------------------------------------------------------------------------
def decoder_forward_ref(params, x, hidden, cell):
    emb = jnp.take(params["embedding"], x, axis=0)
    layer_in = emb
    new_h, new_c = [], []
    for l, lw in enumerate(params["lstm"]):
        gates = (layer_in @ lw["w_ih"].T + hidden[l] @ lw["w_hh"].T
                 + lw["b_ih"] + lw["b_hh"])
        H = hidden.shape[-1]
        i = jax.nn.sigmoid(gates[:, 0 * H:1 * H])
        f = jax.nn.sigmoid(gates[:, 1 * H:2 * H])
        g = jnp.tanh(gates[:, 2 * H:3 * H])
        o = jax.nn.sigmoid(gates[:, 3 * H:4 * H])
        c_l = f * cell[l] + i * g
        h_l = o * jnp.tanh(c_l)
        new_h.append(h_l)
        new_c.append(c_l)
        layer_in = h_l
    pred = layer_in @ params["fc_w"].T + params["fc_b"]
    return pred, jnp.stack(new_h, 0), jnp.stack(new_c, 0)


if __name__ == "__main__":
    # Small shapes consistent with the module.
    input_size = 16        # source/target vocab for embedding
    embedding_size = 32
    hidden_size = 32
    output_size = 12
    num_layers = 2
    batch = 2

    key = jax.random.PRNGKey(0)
    kp, kx, kh, kc = jax.random.split(key, 4)
    params = init_decoder_params(kp, input_size, embedding_size, hidden_size,
                                 output_size, num_layers)
    kernel_params = prepare_decoder_kernel_params(params)

    x = jax.random.randint(kx, (batch,), 0, input_size, dtype=jnp.int32)
    hidden = jax.random.normal(kh, (num_layers, batch, hidden_size), jnp.float32)
    cell = jax.random.normal(kc, (num_layers, batch, hidden_size), jnp.float32)

    fwd = jax.jit(functools.partial(decoder_forward, kernel_params))
    pred, h_out, c_out = fwd(x, hidden, cell)
    jax.block_until_ready((pred, h_out, c_out))

    # sanity-check against the pure-jnp reference
    pred_r, h_r, c_r = decoder_forward_ref(params, x, hidden, cell)
    assert pred.shape == (batch, output_size)
    assert h_out.shape == (num_layers, batch, hidden_size)
    assert c_out.shape == (num_layers, batch, hidden_size)
    assert jnp.allclose(pred, pred_r, atol=1e-5)
    assert jnp.allclose(h_out, h_r, atol=1e-5)
    assert jnp.allclose(c_out, c_r, atol=1e-5)

    print("KERNEL_OK")
</pallas_src>

<mosaic_0001>
module attributes {stable_mosaic.version = 11 : i64} {
  func.func @_decoder_kernel(%arg0: memref<2xi32, #tpu.memory_space<smem>>, %arg1: memref<16x32xf32, #tpu.memory_space<any>>, %arg2: memref<2x32x128xf32, #tpu.memory_space<vmem>>, %arg3: memref<2x32x128xf32, #tpu.memory_space<vmem>>, %arg4: memref<2x1x128xf32, #tpu.memory_space<vmem>>, %arg5: memref<32x128xf32, #tpu.memory_space<vmem>>, %arg6: memref<1x128xf32, #tpu.memory_space<vmem>>, %arg7: memref<2x2x32xf32, #tpu.memory_space<vmem>>, %arg8: memref<2x2x32xf32, #tpu.memory_space<vmem>>, %arg9: memref<2x128xf32, #tpu.memory_space<vmem>>, %arg10: memref<2x2x32xf32, #tpu.memory_space<vmem>>, %arg11: memref<2x2x32xf32, #tpu.memory_space<vmem>>, %arg12: memref<2x32xf32, #tpu.memory_space<vmem>>, %arg13: memref<2x!tpu.dma_semaphore, #tpu.memory_space<semaphore_mem>>) attributes {dimension_semantics = [], scalar_prefetch = 0 : i64, scratch_operands = 2 : i64, tpu.core_type = #tpu.core_type<tc>} {
    %c0 = arith.constant 0 : index
    %0 = memref.load %arg0[%c0] : memref<2xi32, #tpu.memory_space<smem>>
    %c0_i32 = arith.constant 0 : i32
    %c0_i32_0 = arith.constant 0 : i32
    %1 = tpu.memref_slice %arg1[%0, %c0_i32_0] : memref<16x32xf32, #tpu.memory_space<any>> -> memref<1x32xf32, #tpu.memory_space<any>>
    %c0_i32_1 = arith.constant 0 : i32
    %c0_i32_2 = arith.constant 0 : i32
    %2 = tpu.memref_slice %arg12[%c0_i32_1, %c0_i32_2] : memref<2x32xf32, #tpu.memory_space<vmem>> -> memref<1x32xf32, #tpu.memory_space<vmem>>
    %3 = tpu.memref_slice %arg13[%c0_i32] : memref<2x!tpu.dma_semaphore, #tpu.memory_space<semaphore_mem>> -> memref<1x!tpu.dma_semaphore, #tpu.memory_space<semaphore_mem>>
    %4 = tpu.memref_squeeze %3 : memref<1x!tpu.dma_semaphore, #tpu.memory_space<semaphore_mem>> -> memref<!tpu.dma_semaphore, #tpu.memory_space<semaphore_mem>>
    tpu.enqueue_dma source(%1 : memref<1x32xf32, #tpu.memory_space<any>>) target(%2 : memref<1x32xf32, #tpu.memory_space<vmem>>) target_semaphore(%4 : memref<!tpu.dma_semaphore, #tpu.memory_space<semaphore_mem>>)
    %c1 = arith.constant 1 : index
    %5 = memref.load %arg0[%c1] : memref<2xi32, #tpu.memory_space<smem>>
    %c1_i32 = arith.constant 1 : i32
    %c0_i32_3 = arith.constant 0 : i32
    %6 = tpu.memref_slice %arg1[%5, %c0_i32_3] : memref<16x32xf32, #tpu.memory_space<any>> -> memref<1x32xf32, #tpu.memory_space<any>>
    %c1_i32_4 = arith.constant 1 : i32
    %c0_i32_5 = arith.constant 0 : i32
    %7 = tpu.memref_slice %arg12[%c1_i32_4, %c0_i32_5] : memref<2x32xf32, #tpu.memory_space<vmem>> -> memref<1x32xf32, #tpu.memory_space<vmem>>
    %8 = tpu.memref_slice %arg13[%c1_i32] : memref<2x!tpu.dma_semaphore, #tpu.memory_space<semaphore_mem>> -> memref<1x!tpu.dma_semaphore, #tpu.memory_space<semaphore_mem>>
    %9 = tpu.memref_squeeze %8 : memref<1x!tpu.dma_semaphore, #tpu.memory_space<semaphore_mem>> -> memref<!tpu.dma_semaphore, #tpu.memory_space<semaphore_mem>>
    tpu.enqueue_dma source(%6 : memref<1x32xf32, #tpu.memory_space<any>>) target(%7 : memref<1x32xf32, #tpu.memory_space<vmem>>) target_semaphore(%9 : memref<!tpu.dma_semaphore, #tpu.memory_space<semaphore_mem>>)
    %c0_i32_6 = arith.constant 0 : i32
    %c0_i32_7 = arith.constant 0 : i32
    %10 = tpu.memref_slice %arg1[%0, %c0_i32_7] : memref<16x32xf32, #tpu.memory_space<any>> -> memref<1x32xf32, #tpu.memory_space<any>>
    %c0_i32_8 = arith.constant 0 : i32
    %c0_i32_9 = arith.constant 0 : i32
    %11 = tpu.memref_slice %arg12[%c0_i32_8, %c0_i32_9] : memref<2x32xf32, #tpu.memory_space<vmem>> -> memref<1x32xf32, #tpu.memory_space<vmem>>
    %12 = tpu.memref_slice %arg13[%c0_i32_6] : memref<2x!tpu.dma_semaphore, #tpu.memory_space<semaphore_mem>> -> memref<1x!tpu.dma_semaphore, #tpu.memory_space<semaphore_mem>>
    %13 = tpu.memref_squeeze %12 : memref<1x!tpu.dma_semaphore, #tpu.memory_space<semaphore_mem>> -> memref<!tpu.dma_semaphore, #tpu.memory_space<semaphore_mem>>
    tpu.wait_dma2 semaphore(%13 : memref<!tpu.dma_semaphore, #tpu.memory_space<semaphore_mem>>) src(%10 : memref<1x32xf32, #tpu.memory_space<any>>) dst(%11 : memref<1x32xf32, #tpu.memory_space<vmem>>)
    %c1_i32_10 = arith.constant 1 : i32
    %c0_i32_11 = arith.constant 0 : i32
    %14 = tpu.memref_slice %arg1[%5, %c0_i32_11] : memref<16x32xf32, #tpu.memory_space<any>> -> memref<1x32xf32, #tpu.memory_space<any>>
    %c1_i32_12 = arith.constant 1 : i32
    %c0_i32_13 = arith.constant 0 : i32
    %15 = tpu.memref_slice %arg12[%c1_i32_12, %c0_i32_13] : memref<2x32xf32, #tpu.memory_space<vmem>> -> memref<1x32xf32, #tpu.memory_space<vmem>>
    %16 = tpu.memref_slice %arg13[%c1_i32_10] : memref<2x!tpu.dma_semaphore, #tpu.memory_space<semaphore_mem>> -> memref<1x!tpu.dma_semaphore, #tpu.memory_space<semaphore_mem>>
    %17 = tpu.memref_squeeze %16 : memref<1x!tpu.dma_semaphore, #tpu.memory_space<semaphore_mem>> -> memref<!tpu.dma_semaphore, #tpu.memory_space<semaphore_mem>>
    tpu.wait_dma2 semaphore(%17 : memref<!tpu.dma_semaphore, #tpu.memory_space<semaphore_mem>>) src(%14 : memref<1x32xf32, #tpu.memory_space<any>>) dst(%15 : memref<1x32xf32, #tpu.memory_space<vmem>>)
    %c0_14 = arith.constant 0 : index
    %c0_15 = arith.constant 0 : index
    %18 = vector.load %arg12[%c0_14, %c0_15] : memref<2x32xf32, #tpu.memory_space<vmem>>, vector<2x32xf32>
    %c0_16 = arith.constant 0 : index
    %c0_17 = arith.constant 0 : index
    %c0_18 = arith.constant 0 : index
    %19 = vector.load %arg7[%c0_16, %c0_17, %c0_18] : memref<2x2x32xf32, #tpu.memory_space<vmem>>, vector<1x2x32xf32>
    %20 = vector.shape_cast %19 : vector<1x2x32xf32> to vector<2x32xf32>
    %c0_19 = arith.constant 0 : index
    %c0_20 = arith.constant 0 : index
    %c0_21 = arith.constant 0 : index
    %21 = vector.load %arg8[%c0_19, %c0_20, %c0_21] : memref<2x2x32xf32, #tpu.memory_space<vmem>>, vector<1x2x32xf32>
    %22 = vector.shape_cast %21 : vector<1x2x32xf32> to vector<2x32xf32>
    %c0_22 = arith.constant 0 : index
    %c0_23 = arith.constant 0 : index
    %c0_24 = arith.constant 0 : index
    %23 = vector.load %arg2[%c0_22, %c0_23, %c0_24] : memref<2x32x128xf32, #tpu.memory_space<vmem>>, vector<1x32x128xf32>
    %24 = vector.shape_cast %23 : vector<1x32x128xf32> to vector<32x128xf32>
    %cst = arith.constant dense<0.000000e+00> : vector<2x128xf32>
    %25 = tpu.matmul %18, %24, %cst {dimension_numbers = #tpu.dot_dimension_numbers<[1], [0], [0], [1], [0, 0, 1, 1], [], []>} : vector<2x32xf32>, vector<32x128xf32>, vector<2x128xf32> -> vector<2x128xf32>
    %c0_25 = arith.constant 0 : index
    %c0_26 = arith.constant 0 : index
    %c0_27 = arith.constant 0 : index
    %26 = vector.load %arg3[%c0_25, %c0_26, %c0_27] : memref<2x32x128xf32, #tpu.memory_space<vmem>>, vector<1x32x128xf32>
    %27 = vector.shape_cast %26 : vector<1x32x128xf32> to vector<32x128xf32>
    %cst_28 = arith.constant dense<0.000000e+00> : vector<2x128xf32>
    %28 = tpu.matmul %20, %27, %cst_28 {dimension_numbers = #tpu.dot_dimension_numbers<[1], [0], [0], [1], [0, 0, 1, 1], [], []>} : vector<2x32xf32>, vector<32x128xf32>, vector<2x128xf32> -> vector<2x128xf32>
    %29 = arith.addf %25, %28 : vector<2x128xf32>
    %c0_29 = arith.constant 0 : index
    %c0_30 = arith.constant 0 : index
    %c0_31 = arith.constant 0 : index
    %30 = vector.load %arg4[%c0_29, %c0_30, %c0_31] : memref<2x1x128xf32, #tpu.memory_space<vmem>>, vector<1x1x128xf32>
    %31 = vector.shape_cast %30 : vector<1x1x128xf32> to vector<1x128xf32>
    %32 = vector.broadcast %31 : vector<1x128xf32> to vector<2x128xf32>
    %33 = arith.addf %29, %32 : vector<2x128xf32>
    %34 = arith.negf %33 : vector<2x128xf32>
    %35 = math.exp %34 : vector<2x128xf32>
    %cst_32 = arith.constant 1.000000e+00 : f32
    %36 = vector.broadcast %cst_32 : f32 to vector<2x128xf32>
    %37 = arith.addf %36, %35 : vector<2x128xf32>
    %38 = arith.divf %36, %37 : vector<2x128xf32>
    %39 = math.tanh %33 : vector<2x128xf32>
    %40 = vector.extract_strided_slice %38 {offsets = [0, 0], sizes = [2, 32], strides = [1, 1]} : vector<2x128xf32> to vector<2x32xf32>
    %41 = vector.extract_strided_slice %38 {offsets = [0, 32], sizes = [2, 32], strides = [1, 1]} : vector<2x128xf32> to vector<2x32xf32>
    %42 = vector.extract_strided_slice %39 {offsets = [0, 64], sizes = [2, 32], strides = [1, 1]} : vector<2x128xf32> to vector<2x32xf32>
    %43 = vector.extract_strided_slice %38 {offsets = [0, 96], sizes = [2, 32], strides = [1, 1]} : vector<2x128xf32> to vector<2x32xf32>
    %44 = arith.mulf %41, %22 : vector<2x32xf32>
    %45 = arith.mulf %40, %42 : vector<2x32xf32>
    %46 = arith.addf %44, %45 : vector<2x32xf32>
    %47 = math.tanh %46 : vector<2x32xf32>
    %48 = arith.mulf %43, %47 : vector<2x32xf32>
    %c0_33 = arith.constant 0 : index
    %c0_34 = arith.constant 0 : index
    %c0_35 = arith.constant 0 : index
    %49 = vector.load %arg10[%c0_33, %c0_34, %c0_35] : memref<2x2x32xf32, #tpu.memory_space<vmem>>, vector<1x2x32xf32>
    %50 = vector.shape_cast %49 : vector<1x2x32xf32> to vector<2x32xf32>
    %51 = vector.shape_cast %48 : vector<2x32xf32> to vector<1x2x32xf32>
    tpu.vector_store %arg10[%c0_33, %c0_34, %c0_35], %51 {strides = array<i32>} : memref<2x2x32xf32, #tpu.memory_space<vmem>>, vector<1x2x32xf32>,
    %c0_36 = arith.constant 0 : index
    %c0_37 = arith.constant 0 : index
    %c0_38 = arith.constant 0 : index
    %52 = vector.load %arg11[%c0_36, %c0_37, %c0_38] : memref<2x2x32xf32, #tpu.memory_space<vmem>>, vector<1x2x32xf32>
    %53 = vector.shape_cast %52 : vector<1x2x32xf32> to vector<2x32xf32>
    %54 = vector.shape_cast %46 : vector<2x32xf32> to vector<1x2x32xf32>
    tpu.vector_store %arg11[%c0_36, %c0_37, %c0_38], %54 {strides = array<i32>} : memref<2x2x32xf32, #tpu.memory_space<vmem>>, vector<1x2x32xf32>,
    %c1_39 = arith.constant 1 : index
    %c0_40 = arith.constant 0 : index
    %c0_41 = arith.constant 0 : index
    %55 = vector.load %arg7[%c1_39, %c0_40, %c0_41] : memref<2x2x32xf32, #tpu.memory_space<vmem>>, vector<1x2x32xf32>
    %56 = vector.shape_cast %55 : vector<1x2x32xf32> to vector<2x32xf32>
    %c1_42 = arith.constant 1 : index
    %c0_43 = arith.constant 0 : index
    %c0_44 = arith.constant 0 : index
    %57 = vector.load %arg8[%c1_42, %c0_43, %c0_44] : memref<2x2x32xf32, #tpu.memory_space<vmem>>, vector<1x2x32xf32>
    %58 = vector.shape_cast %57 : vector<1x2x32xf32> to vector<2x32xf32>
    %c1_45 = arith.constant 1 : index
    %c0_46 = arith.constant 0 : index
    %c0_47 = arith.constant 0 : index
    %59 = vector.load %arg2[%c1_45, %c0_46, %c0_47] : memref<2x32x128xf32, #tpu.memory_space<vmem>>, vector<1x32x128xf32>
    %60 = vector.shape_cast %59 : vector<1x32x128xf32> to vector<32x128xf32>
    %cst_48 = arith.constant dense<0.000000e+00> : vector<2x128xf32>
    %61 = tpu.matmul %48, %60, %cst_48 {dimension_numbers = #tpu.dot_dimension_numbers<[1], [0], [0], [1], [0, 0, 1, 1], [], []>} : vector<2x32xf32>, vector<32x128xf32>, vector<2x128xf32> -> vector<2x128xf32>
    %c1_49 = arith.constant 1 : index
    %c0_50 = arith.constant 0 : index
    %c0_51 = arith.constant 0 : index
    %62 = vector.load %arg3[%c1_49, %c0_50, %c0_51] : memref<2x32x128xf32, #tpu.memory_space<vmem>>, vector<1x32x128xf32>
    %63 = vector.shape_cast %62 : vector<1x32x128xf32> to vector<32x128xf32>
    %cst_52 = arith.constant dense<0.000000e+00> : vector<2x128xf32>
    %64 = tpu.matmul %56, %63, %cst_52 {dimension_numbers = #tpu.dot_dimension_numbers<[1], [0], [0], [1], [0, 0, 1, 1], [], []>} : vector<2x32xf32>, vector<32x128xf32>, vector<2x128xf32> -> vector<2x128xf32>
    %65 = arith.addf %61, %64 : vector<2x128xf32>
    %c1_53 = arith.constant 1 : index
    %c0_54 = arith.constant 0 : index
    %c0_55 = arith.constant 0 : index
    %66 = vector.load %arg4[%c1_53, %c0_54, %c0_55] : memref<2x1x128xf32, #tpu.memory_space<vmem>>, vector<1x1x128xf32>
    %67 = vector.shape_cast %66 : vector<1x1x128xf32> to vector<1x128xf32>
    %68 = vector.broadcast %67 : vector<1x128xf32> to vector<2x128xf32>
    %69 = arith.addf %65, %68 : vector<2x128xf32>
    %70 = arith.negf %69 : vector<2x128xf32>
    %71 = math.exp %70 : vector<2x128xf32>
    %cst_56 = arith.constant 1.000000e+00 : f32
    %72 = vector.broadcast %cst_56 : f32 to vector<2x128xf32>
    %73 = arith.addf %72, %71 : vector<2x128xf32>
    %74 = arith.divf %72, %73 : vector<2x128xf32>
    %75 = math.tanh %69 : vector<2x128xf32>
    %76 = vector.extract_strided_slice %74 {offsets = [0, 0], sizes = [2, 32], strides = [1, 1]} : vector<2x128xf32> to vector<2x32xf32>
    %77 = vector.extract_strided_slice %74 {offsets = [0, 32], sizes = [2, 32], strides = [1, 1]} : vector<2x128xf32> to vector<2x32xf32>
    %78 = vector.extract_strided_slice %75 {offsets = [0, 64], sizes = [2, 32], strides = [1, 1]} : vector<2x128xf32> to vector<2x32xf32>
    %79 = vector.extract_strided_slice %74 {offsets = [0, 96], sizes = [2, 32], strides = [1, 1]} : vector<2x128xf32> to vector<2x32xf32>
    %80 = arith.mulf %77, %58 : vector<2x32xf32>
    %81 = arith.mulf %76, %78 : vector<2x32xf32>
    %82 = arith.addf %80, %81 : vector<2x32xf32>
    %83 = math.tanh %82 : vector<2x32xf32>
    %84 = arith.mulf %79, %83 : vector<2x32xf32>
    %c1_57 = arith.constant 1 : index
    %c0_58 = arith.constant 0 : index
    %c0_59 = arith.constant 0 : index
    %85 = vector.load %arg10[%c1_57, %c0_58, %c0_59] : memref<2x2x32xf32, #tpu.memory_space<vmem>>, vector<1x2x32xf32>
    %86 = vector.shape_cast %85 : vector<1x2x32xf32> to vector<2x32xf32>
    %87 = vector.shape_cast %84 : vector<2x32xf32> to vector<1x2x32xf32>
    tpu.vector_store %arg10[%c1_57, %c0_58, %c0_59], %87 {strides = array<i32>} : memref<2x2x32xf32, #tpu.memory_space<vmem>>, vector<1x2x32xf32>,
    %c1_60 = arith.constant 1 : index
    %c0_61 = arith.constant 0 : index
    %c0_62 = arith.constant 0 : index
    %88 = vector.load %arg11[%c1_60, %c0_61, %c0_62] : memref<2x2x32xf32, #tpu.memory_space<vmem>>, vector<1x2x32xf32>
    %89 = vector.shape_cast %88 : vector<1x2x32xf32> to vector<2x32xf32>
    %90 = vector.shape_cast %82 : vector<2x32xf32> to vector<1x2x32xf32>
    tpu.vector_store %arg11[%c1_60, %c0_61, %c0_62], %90 {strides = array<i32>} : memref<2x2x32xf32, #tpu.memory_space<vmem>>, vector<1x2x32xf32>,
    %c0_63 = arith.constant 0 : index
    %c0_64 = arith.constant 0 : index
    %91 = vector.load %arg5[%c0_63, %c0_64] : memref<32x128xf32, #tpu.memory_space<vmem>>, vector<32x128xf32>
    %cst_65 = arith.constant dense<0.000000e+00> : vector<2x128xf32>
    %92 = tpu.matmul %84, %91, %cst_65 {dimension_numbers = #tpu.dot_dimension_numbers<[1], [0], [0], [1], [0, 0, 1, 1], [], []>} : vector<2x32xf32>, vector<32x128xf32>, vector<2x128xf32> -> vector<2x128xf32>
    %c0_66 = arith.constant 0 : index
    %c0_67 = arith.constant 0 : index
    %93 = vector.load %arg6[%c0_66, %c0_67] : memref<1x128xf32, #tpu.memory_space<vmem>>, vector<1x128xf32>
    %94 = vector.broadcast %93 : vector<1x128xf32> to vector<2x128xf32>
    %95 = arith.addf %92, %94 : vector<2x128xf32>
    %c0_68 = arith.constant 0 : index
    %c0_69 = arith.constant 0 : index
    %96 = vector.load %arg9[%c0_68, %c0_69] : memref<2x128xf32, #tpu.memory_space<vmem>>, vector<2x128xf32>
    tpu.vector_store %arg9[%c0_68, %c0_69], %95 {strides = array<i32>} : memref<2x128xf32, #tpu.memory_space<vmem>>, vector<2x128xf32>,
    return
  }
}

</mosaic_0001>

<bundles_post_ra>
// kernel: decoder_forward.1
= control target key start
LH: loop header
LB: loop body
LE: loop exit
PB: predicated region body
PF: predicated region fallthrough
CT: control target
= control target key end

     0   :  { %17 = vsyncpa [#allocation7], 0  ;;  %s1373_s0 = inlined_call_operand.hbm [shape: s32[2], index: 0, kind: input, shape index: {}]   ;;  %s1374_s1 = inlined_call_operand.hbm [shape: f32[16,32], index: 1, kind: input, shape index: {}]   ;;  %s1375_s2 = inlined_call_operand.hbm [shape: f32[2,32,128], index: 2, kind: input, shape index: {}]   ;;  %s1376_s3 = inlined_call_operand.hbm [shape: f32[2,32,128], index: 3, kind: input, shape index: {}]   ;;  %s1377_s4 = inlined_call_operand.vmem [shape: f32[2,1,128], index: 4, kind: input, shape index: {}]   ;;  %s1378_s5 = inlined_call_operand.hbm [shape: f32[32,128], index: 5, kind: input, shape index: {}]   ;;  %s1379_s6 = inlined_call_operand.vmem [shape: f32[1,128], index: 6, kind: input, shape index: {}]   ;;  %s1380_s7 = inlined_call_operand.hbm [shape: f32[2,2,32], index: 7, kind: input, shape index: {}]   ;;  %s1381_s8 = inlined_call_operand.vmem [shape: f32[2,2,32], index: 8, kind: input, shape index: {}]   ;;  %s1382_s9 = inlined_call_operand.hbm [shape: f32[2,128], index: 9, kind: output, shape index: {0}]   ;;  %s1383_s10 = inlined_call_operand.hbm [shape: f32[2,2,32], index: 10, kind: output, shape index: {1}]   ;;  %s1384_s11 = inlined_call_operand.hbm [shape: f32[2,2,32], index: 11, kind: output, shape index: {2}]  }
   0x1   :  { %18 = vsyncpa [#allocation5], 0 }
   0x2   :  { %19 = vsyncpa [#allocation10], 0 }
   0x3   :  { %20 = vsyncpa [#allocation13], 0 }
   0x4   :  { %21 = vsyncpa [#allocation6], 0 }
   0x5   :  { %22 = vsyncpa [#allocation16], 0  ;;  %s1089_s17 = smov [#allocation9]   ;;  %s1090_s19 = smov [#allocation8]  }
   0x6   :  { %s48_s18 = sshll.u32 %s1089_s17, 4  ;;  %s36_s20 = sshll.u32 %s1090_s19, 4  ;;  %s49_s18 = int_to_ptr.vmem [resolvable:$true] %s48_s18  ;;  %s37_s20 = int_to_ptr.vmem [resolvable:$true] %s36_s20 }
   0x7   :  { %s861_s23 = scalar_lea.hbm %s1376_s3, 1024 }
   0x8   :  { %p862_p0 = scmp.ne.s32.totalorder %s1376_s3, %s861_s23  ;;  %p865_p1 = scmp.lt.u32.totalorder %s861_s23, %s1376_s3 }
   0xa   :  { %p867_p2 = pnand %p865_p1, %p862_p0 }
   0xc   :  { %870 = shalt.err (!%p867_p2)
}
   0xd   :  { %s871_s28 = scalar_lea.vmem %s49_s18, 1024  ;;  %p876_p4 = scmp.lt.s32.totalorder %s49_s18, %s49_s18 }
   0xe   :  { %p872_p3 = scmp.ne.s32.totalorder %s49_s18, %s871_s28  ;;  %p877_p5 = scmp.lt.s32.totalorder %s871_s28, %s871_s28 }
  0x10   :  { %p878_p6 = por %p877_p5, %p876_p4 }
  0x12   :  { %p879_p7 = pnand %p878_p6, %p872_p3 }
  0x14   :  { %882 = shalt.err (!%p879_p7)
}
  0x15   :  { %s1091_s29 = smov 128   ;;  %s1092_s30 = smov 8  }
  0x16   :  { %54 = dma.hbm_to_vmem [thread:$0]  %s1376_s3, 1024, %s49_s18, [#allocation10], %s1091_s29, %s1091_s29, %s1092_s30  }
  0x17   :  { %s883_s16 = scalar_lea.hbm %s1373_s0, 16 }
  0x18   :  { %p884_p8 = scmp.ne.s32.totalorder %s1373_s0, %s883_s16  ;;  %p887_p9 = scmp.lt.u32.totalorder %s883_s16, %s1373_s0 }
  0x1a   :  { %p889_p10 = pnand %p887_p9, %p884_p8 }
  0x1c   :  { %892 = shalt.err (!%p889_p10)
}
  0x1d   :  { %s1093_s23 = smov [#allocation4]   ;;  %s893_s26 = scalar_lea.hbm %s1375_s2, 1024 }
  0x1e   :  { %30 = dma.hbm_to_smem %s1373_s0, 16, %s1093_s23, [#allocation7]  }
  0x1f   :  { %p894_p11 = scmp.ne.s32.totalorder %s1375_s2, %s893_s26  ;;  %p897_p12 = scmp.lt.u32.totalorder %s893_s26, %s1375_s2 }
  0x21   :  { %p899_p13 = pnand %p897_p12, %p894_p11 }
  0x23   :  { %902 = shalt.err (!%p899_p13)
}
  0x24   :  { %s903_s14 = scalar_lea.vmem %s37_s20, 1024  ;;  %p908_p1 = scmp.lt.s32.totalorder %s37_s20, %s37_s20 }
  0x25   :  { %p904_p0 = scmp.ne.s32.totalorder %s37_s20, %s903_s14  ;;  %p909_p2 = scmp.lt.s32.totalorder %s903_s14, %s903_s14 }
  0x27   :  { %p910_p3 = por %p909_p2, %p908_p1 }
  0x29   :  { %p911_p4 = pnand %p910_p3, %p904_p0 }
  0x2b   :  { %914 = shalt.err (!%p911_p4)
}
  0x2c   :  { %42 = dma.hbm_to_vmem [thread:$0]  %s1375_s2, 1024, %s37_s20, [#allocation5], %s1091_s29, %s1091_s29, %s1092_s30  }
  0x2d   :  { %s1094_s16 = smov [#allocation11]   ;;  %s1095_s19 = smov [#allocation12]  }
  0x2e   :  { %s62_s17 = sshll.u32 %s1094_s16, 4  ;;  %s76_s21 = sshll.u32 %s1095_s19, 4  ;;  %s63_s17 = int_to_ptr.vmem [resolvable:$true] %s62_s17  ;;  %s77_s21 = int_to_ptr.vmem [resolvable:$true] %s76_s21 }
  0x2f   :  { %s915_s24 = scalar_lea.hbm %s1378_s5, 512 }
  0x30   :  { %p916_p5 = scmp.ne.s32.totalorder %s1378_s5, %s915_s24  ;;  %p919_p6 = scmp.lt.u32.totalorder %s915_s24, %s1378_s5 }
  0x32   :  { %p921_p7 = pnand %p919_p6, %p916_p5 }
  0x34   :  { %924 = shalt.err (!%p921_p7)
}
  0x35   :  { %s925_s2 = scalar_lea.vmem %s63_s17, 512  ;;  %p930_p9 = scmp.lt.s32.totalorder %s63_s17, %s63_s17 }
  0x36   :  { %p926_p8 = scmp.ne.s32.totalorder %s63_s17, %s925_s2  ;;  %p931_p10 = scmp.lt.s32.totalorder %s925_s2, %s925_s2 }
  0x38   :  { %p932_p11 = por %p931_p10, %p930_p9 }
  0x3a   :  { %p933_p12 = pnand %p932_p11, %p926_p8 }
  0x3c   :  { %936 = shalt.err (!%p933_p12)
}
  0x3d   :  { %68 = dma.hbm_to_vmem [thread:$0]  %s1378_s5, 512, %s63_s17, [#allocation10], %s1091_s29, %s1091_s29, %s1092_s30  }
  0x3e   :  { %s937_s13 = scalar_lea.hbm %s1380_s7, 64 }
  0x3f   :  { %p938_p13 = scmp.ne.s32.totalorder %s1380_s7, %s937_s13  ;;  %p941_p0 = scmp.lt.u32.totalorder %s937_s13, %s1380_s7 }
  0x41   :  { %p943_p1 = pnand %p941_p0, %p938_p13 }
  0x43   :  { %946 = shalt.err (!%p943_p1)
}
  0x44   :  { %s947_s19 = scalar_lea.vmem %s77_s21, 64  ;;  %p952_p3 = scmp.lt.s32.totalorder %s77_s21, %s77_s21 }
  0x45   :  { %p948_p2 = scmp.ne.s32.totalorder %s77_s21, %s947_s19  ;;  %p953_p4 = scmp.lt.s32.totalorder %s947_s19, %s947_s19 }
  0x47   :  { %p954_p5 = por %p953_p4, %p952_p3 }
  0x49   :  { %p955_p6 = pnand %p954_p5, %p948_p2 }
  0x4b   :  { %958 = shalt.err (!%p955_p6)
}
  0x4c   :  { %s1096_s5 = smov 32   ;;  %s1097_s29 = smov 2  }
  0x4d   :  { %82 = dma.hbm_to_vmem [thread:$0]  %s1380_s7, 64, %s77_s21, [#allocation13], %s1096_s5, %s1096_s5, %s1097_s29  }
  0x4e   :  { %1073 = dma.done.wait [#allocation7], 16  }
  0x4f   :  { %1074 = vsyncadd [#allocation7], 4294967280 }
  0x50   :  { %1075 = dma.done.wait [#allocation5], 1024  }
  0x51   :  { %1076 = vsyncadd [#allocation5], 4294966272 }
  0x52   :  { %1077 = dma.done.wait [#allocation10], 1536  }
  0x53   :  { %1078 = vsyncadd [#allocation10], 4294965760 }
  0x54   :  { %1079 = dma.done.wait [#allocation13], 64  }
  0x55   :  { %1080 = vsyncadd [#allocation13], 4294967232 }
  0x56   :  { %100 = sfence }
  0x57   :  { %s101_s22 = sld [smem:[#allocation4]]  ;;  %s1240_s23 = sld [smem:[#allocation4 + $0x1]] }
  0x58   :  { %s1098_s24 = smov [#allocation2]   ;;  %s1099_s3 = smov [#allocation2 + $0x1]  }
  0x59   :  { %s111_s25 = sshll.u32 %s1098_s24, 4  ;;  %s127_s18 = sshll.u32 %s1099_s3, 4  ;;  %s1242_s25 = int_to_ptr.vmem [resolvable:$true] %s111_s25  ;;  %s1244_s18 = int_to_ptr.vmem [resolvable:$true] %s127_s18 }
  0x5a   :  { %s961_s13 = scalar_lea.hbm %s1374_s1, 256 }
  0x5d   :  { %s699_s7 = sshll.u32 %s101_s22, 4  ;;  %s701_s20 = sshll.u32 %s1240_s23, 4 }
  0x5e   :  { %s103_s2 = scalar_lea.hbm %s1374_s1, %s699_s7 }
  0x5f   :  { %s959_s27 = scalar_lea.hbm %s103_s2, 16  ;;  %p962_p8 = scmp.lt.u32.totalorder %s103_s2, %s1374_s1 }
  0x60   :  { %p960_p7 = scmp.ne.s32.totalorder %s103_s2, %s959_s27  ;;  %p963_p9 = scmp.lt.u32.totalorder %s961_s13, %s959_s27 }
  0x61   :  { %p965_p11 = scmp.lt.u32.totalorder %s959_s27, %s103_s2 }
  0x62   :  { %p964_p10 = por %p963_p9, %p962_p8 }
  0x64   :  { %p966_p12 = por %p965_p11, %p964_p10 }
  0x66   :  { %p967_p13 = pnand %p966_p12, %p960_p7 }
  0x68   :  { %970 = shalt.err (!%p967_p13)  }
  0x69   :  { %s971_s15 = scalar_lea.vmem %s1242_s25, 16  ;;  %s975_s16 = scalar_lea.vmem %s1242_s25, 32 }
  0x6a   :  { %p972_p0 = scmp.ne.s32.totalorder %s1242_s25, %s971_s15  ;;  %p976_p1 = scmp.lt.s32.totalorder %s1242_s25, %s1242_s25 }
  0x6b   :  { %p977_p2 = scmp.lt.s32.totalorder %s975_s16, %s971_s15 }
  0x6d   :  { %p978_p3 = por %p977_p2, %p976_p1 }
  0x6f   :  { %p979_p4 = pnand %p978_p3, %p972_p0 }
  0x71   :  { %982 = shalt.err (!%p979_p4)  }
  0x72   :  { %114 = dma.hbm_to_vmem [thread:$0]  %s103_s2, 16, %s1242_s25, [#allocation3] }
  0x73   :  { %s117_s17 = scalar_lea.hbm %s1374_s1, %s701_s20 }
  0x74   :  { %s983_s22 = scalar_lea.hbm %s117_s17, 16  ;;  %p986_p6 = scmp.lt.u32.totalorder %s117_s17, %s1374_s1 }
  0x75   :  { %p984_p5 = scmp.ne.s32.totalorder %s117_s17, %s983_s22  ;;  %p987_p7 = scmp.lt.u32.totalorder %s961_s13, %s983_s22 }
  0x76   :  { %p989_p9 = scmp.lt.u32.totalorder %s983_s22, %s117_s17 }
  0x77   :  { %p988_p8 = por %p987_p7, %p986_p6 }
  0x79   :  { %p990_p10 = por %p989_p9, %p988_p8 }
  0x7b   :  { %p991_p11 = pnand %p990_p10, %p984_p5 }
  0x7d   :  { %994 = shalt.err (!%p991_p11)  }
  0x7e   :  { %s995_s3 = scalar_lea.vmem %s1244_s18, 16  ;;  %p1000_p13 = scmp.lt.s32.totalorder %s1244_s18, %s1242_s25 }
  0x7f   :  { %p996_p12 = scmp.ne.s32.totalorder %s1244_s18, %s995_s3  ;;  %p1001_p0 = scmp.lt.s32.totalorder %s975_s16, %s995_s3 }
  0x81   :  { %p1002_p1 = por %p1001_p0, %p1000_p13 }
  0x83   :  { %p1003_p2 = pnand %p1002_p1, %p996_p12 }
  0x85   :  { %1006 = shalt.err (!%p1003_p2)  }
  0x86   :  { %130 = dma.hbm_to_vmem [thread:$0]  %s117_s17, 16, %s1244_s18, [#allocation3 + $0x1] }
  0x87   :  { %1081 = dma.done.wait [#allocation3], 16 }
  0x88   :  { %1082 = vsyncadd [#allocation3], 4294967280 }
  0x89   :  { %1083 = dma.done.wait [#allocation3 + $0x1], 16 }
  0x8a   :  { %1084 = vsyncadd [#allocation3 + $0x1], 4294967280  ;;  %v1100_v0 = vmov 0.0|0.0   ;;  %vm1101_vm0 = vmmov 0   ;;  %v1102_v1 = vmov 0.0   ;;  %v143_v2 = vld [vmem:[#allocation9] sm:$0xff] }
  0x8b   :  { %796 = vmatprep.subr.bf16.mxu0 %v1100_v0  ;;  %802 = vmatprep.subr.bf16.mxu1 %v1100_v0  ;;  %v144_v3 = vld [vmem:[#allocation9 + $0x8] sm:$0xff]  ;;  %v139_v4 = vld [vmem:[#allocation8] sm:$0xff]  ;;  %v145_v7 = vld [vmem:[#allocation9 + $0x10] sm:$0xff]  ;;  %vm147_vm1 = vcmask 261120   ;;  %s1103_s18 = smov 64   ;;  %vm334_vm2 = vcmask 254976  }
  0x8c   :  { %749 = vmatprep.mubr.msk.f32.mxu0 %vm1101_vm0, %v1102_v1  ;;  %760 = vmatprep.mubr.msk.f32.mxu1 %vm1101_vm0, %v1102_v1  ;;  %v797_v5 = vpack.c.bf16 %v144_v3, %v143_v2  ;;  %v140_v6 = vld [vmem:[#allocation8 + $0x8] sm:$0xff]  ;;  %v146_v8 = vld [vmem:[#allocation9 + $0x18] sm:$0xff]  ;;  %v141_v10 = vld [vmem:[#allocation8 + $0x10] sm:$0xff] }
  0x8d   :  { %v803_v9 = vpack.c.bf16 %v140_v6, %v139_v4  ;;  %v142_v11 = vld [vmem:[#allocation8 + $0x18] sm:$0xff]  ;;  %v800_v12 = vpack.c.bf16 %v146_v8, %v145_v7  ;;  %v137_v14 = vld [vmem:[#allocation12] sm:$0x3]  ;;  %v704_v18 = vld [vmem:[%s1377_s4] ss:$0 sm:$0xff] }
  0x8e   :  { %798 = vmatpush3.bf16.msra.mxu0 %v797_v5  ;;  %v806_v13 = vpack.c.bf16 %v142_v11, %v141_v10  ;;  %v136_v15 = vld [vmem:[#allocation2] sm:$0x3]  ;;  %v138_v24 = vld [vmem:[%s1381_s8] sm:$0x3]  ;;  %v351_v35 = vld [vmem:[#allocation9 + $0x20] sm:$0xff] }
  0x8f   :  { %804 = vmatpush3.bf16.msra.mxu1 %v803_v9  ;;  %799 = vmatprep.subr.bf16.mxu0 %v1100_v0  ;;  %v352_v36 = vld [vmem:[#allocation9 + $0x28] sm:$0xff]  ;;  %v346_v37 = vld [vmem:[#allocation8 + $0x20] sm:$0xff]  ;;  %v353_v40 = vld [vmem:[#allocation9 + $0x30] sm:$0xff] }
  0x90   :  { %805 = vmatprep.subr.bf16.mxu1 %v1100_v0  ;;  %v809_v38 = vpack.c.bf16 %v352_v36, %v351_v35  ;;  %v347_v39 = vld [vmem:[#allocation8 + $0x28] sm:$0xff]  ;;  %v354_v41 = vld [vmem:[#allocation9 + $0x38] sm:$0xff]  ;;  %v348_v43 = vld [vmem:[#allocation8 + $0x30] sm:$0xff] }
  0x91   :  { %v815_v42 = vpack.c.bf16 %v347_v39, %v346_v37  ;;  %v349_v44 = vld [vmem:[#allocation8 + $0x38] sm:$0xff]  ;;  %v812_v45 = vpack.c.bf16 %v354_v41, %v353_v40  ;;  %v342_v47 = vld [vmem:[#allocation12 + $0x2] sm:$0x3]  ;;  %v706_v51 = vld [vmem:[%s1381_s8 + $0x2] sm:$0x3]  ;;  %s1105_s8 = smov [#allocation15]  }
  0x92   :  { %801 = vmatpush3.bf16.msra.mxu0 %v800_v12  ;;  %v818_v46 = vpack.c.bf16 %v349_v44, %v348_v43  ;;  %v710_v56 = vld [vmem:[%s1377_s4 + $0x1] ss:$0 sm:$0xff]  ;;  %v549_v8 = vld [vmem:[#allocation11] sm:$0xff]  ;;  %v551_v10 = vld [vmem:[#allocation11 + $0x10] sm:$0xff]  ;;  %s1104_s4 = smov 96   ;;  %s648_s28 = sshll.u32 %s1105_s8, 4  ;;  %s649_s28 = int_to_ptr.vmem [resolvable:$true] %s648_s28 }
  0x93   :  { %807 = vmatpush3.bf16.msra.mxu1 %v806_v13  ;;  %808 = vmatprep.subr.bf16.mxu0 %v1100_v0  ;;  %v550_v9 = vld [vmem:[#allocation11 + $0x8] sm:$0xff]  ;;  %v552_v12 = vld [vmem:[#allocation11 + $0x18] sm:$0xff]  ;;  %s1007_s12 = scalar_lea.vmem %s649_s28, 64  ;;  %p1012_p4 = scmp.lt.s32.totalorder %s649_s28, %s649_s28 }
  0x94   :  { %814 = vmatprep.subr.bf16.mxu1 %v1100_v0  ;;  %v821_v11 = vpack.c.bf16 %v550_v9, %v549_v8  ;;  %v824_v13 = vpack.c.bf16 %v552_v12, %v551_v10  ;;  %p1008_p3 = scmp.ne.s32.totalorder %s649_s28, %s1007_s12  ;;  %p1013_p5 = scmp.lt.s32.totalorder %s1007_s12, %s1007_s12 }
  0x95   :  { %750 = vmatmul.mubr.msk.f32.vlgmr.msra.gmra.mrb[0].mxu0 %vm147_vm1, %v137_v14 }
  0x96   :  { %761 = vmatmul.mubr.msk.f32.vlgmr.msra.gmra.mrb[0].mxu1 %vm147_vm1, %v136_v15  ;;  %771 = vmatprep.mubr.msk.f32.mxu0 %vm1101_vm0, %v1102_v1  ;;  %p1014_p6 = por %p1013_p5, %p1012_p4 }
  0x97   :  { %782 = vmatprep.mubr.msk.f32.mxu1 %vm1101_vm0, %v1102_v1  ;;  %810 = vmatpush3.bf16.msra.mxu0 %v809_v38 }
  0x98   :  { %816 = vmatpush3.bf16.msra.mxu1 %v815_v42  ;;  %811 = vmatprep.subr.bf16.mxu0 %v1100_v0  ;;  %p1015_p7 = pnand %p1014_p6, %p1008_p3 }
  0x99   :  { %817 = vmatprep.subr.bf16.mxu1 %v1100_v0 }
  0x9b   :  { %813 = vmatpush3.bf16.msra.mxu0 %v812_v45 }
  0x9c   :  { %819 = vmatpush3.bf16.msra.mxu1 %v818_v46  ;;  %820 = vmatprep.subr.bf16.mxu0 %v1100_v0 }
  0x9e   :  { %772 = vmatmul.mubr.msk.f32.vlgmr.msra.gmra.mrb[2].mxu0 %vm147_vm1, %v342_v47 }
  0x9f   :  { %793 = vmatprep.mubr.msk.f32.mxu0 %vm1101_vm0, %v1102_v1  ;;  %822 = vmatpush3.bf16.msra.mxu0 %v821_v11 }
  0xa0   :  { %823 = vmatprep.subr.bf16.mxu0 %v1100_v0 }
  0xa3   :  { %825 = vmatpush3.bf16.msra.mxu0 %v824_v13 }
 0x168   :  { %v217_v16 = vpop.f32.mrb[0].mxu0 }
 0x169   :  { %v290_v17 = vpop.f32.mrb[0].mxu1  ;;  %v751_v19 = vpop.f32.mrb[1].mxu0 }
 0x16a   :  { %v291_v20 = vadd.f32 %v290_v17, %v217_v16  ;;  %v762_v21 = vpop.f32.mrb[1].mxu1 }
 0x16c   :  { %v301_v22 = vadd.f32 %v704_v18, %v291_v20 }
 0x16e   :  { %845 = vtanh.f32 %v301_v22  ;;  %v705_v25 = vmul.f32 -1.442695, %v301_v22 }
 0x170   :  { %847 = vpow2.f32 %v705_v25 }
 0x171   :  { %v424_v52 = vpop.f32.mrb[2].mxu0 }
 0x172   :  { %v773_v53 = vpop.f32.mrb[3].mxu0 }
 0x178   :  { %v846_v23 = vpop.eup %845 }
 0x179   :  { %315 = vrot.lane.b32.xlu0 %v846_v23, %s1103_s18 }
 0x17a   :  { %v848_v26 = vpop.eup %847 }
 0x17b   :  { %v305_v27 = vadd.f32 1.0, %v848_v26 }
 0x17d   :  { %310 = vrot.lane.b32.xlu0 %v138_v24, %s1096_s5  ;;  %849 = vrcp.f32 %v305_v27 }
 0x187   :  { %v850_v28 = vpop.eup %849 }
 0x1eb   :  { %v316_v29 = vpop.permute.xlu0 %315 }
 0x1ec   :  { %v318_v30 = vmul.f32 %v850_v28, %v316_v29 }
 0x1ee   :  { %320 = vrot.lane.b32.xlu1 %v318_v30, %s1096_s5 }
 0x1ef   :  { %v311_v31 = vpop.permute.xlu0 %310 }
 0x1f0   :  { %v313_v32 = vmul.f32 %v850_v28, %v311_v31 }
 0x260   :  { %v321_v33 = vpop.permute.xlu1 %320 }
 0x261   :  { %v1298_v34 = vadd.f32 %v321_v33, %v313_v32 }
 0x263   :  { %851 = vtanh.f32 %v1298_v34 }
 0x26d   :  { %v852_v48 = vpop.eup %851 }
 0x26e   :  { %326 = vrot.lane.b32.xlu1 %v852_v48, %s1103_s18 }
 0x2e0   :  { %v327_v49 = vpop.permute.xlu1 %326 }
 0x2e1   :  { %v329_v50 = vmul.f32 %v850_v28, %v327_v49 }
 0x2e3   :  { %331 = vrot.lane.b32.xlu0 %v329_v50, %s1096_s5 }
 0x2e7   :  { %517 = vrot.lane.b32.xlu0 %v706_v51, %s1096_s5 }
 0x355   :  { %v332_v54 = vpop.permute.xlu0 %331 }
 0x356   :  { %335 = vst.msk [vmem:[#allocation15] sm:$0x3] %vm334_vm2, %v332_v54  ;;  %783 = vmatmul.mubr.msk.f32.vlgmr.msra.gmra.mrb[2].mxu1 %vm147_vm1, %v332_v54 }
 0x359   :  { %v518_v4 = vpop.permute.xlu0 %517 }
 0x429   :  { %v496_v55 = vpop.f32.mrb[2].mxu1 }
 0x42a   :  { %v497_v57 = vadd.f32 %v496_v55, %v424_v52  ;;  %v784_v58 = vpop.f32.mrb[3].mxu1 }
 0x42c   :  { %v508_v59 = vadd.f32 %v710_v56, %v497_v57 }
 0x42e   :  { %853 = vtanh.f32 %v508_v59  ;;  %v711_v61 = vmul.f32 -1.442695, %v508_v59 }
 0x430   :  { %855 = vpow2.f32 %v711_v61 }
 0x438   :  { %v854_v60 = vpop.eup %853 }
 0x439   :  { %522 = vrot.lane.b32.xlu1 %v854_v60, %s1103_s18 }
 0x43a   :  { %v856_v62 = vpop.eup %855 }
 0x43b   :  { %v512_v63 = vadd.f32 1.0, %v856_v62 }
 0x43d   :  { %857 = vrcp.f32 %v512_v63 }
 0x447   :  { %v858_v1 = vpop.eup %857 }
 0x448   :  { %v520_v5 = vmul.f32 %v858_v1, %v518_v4 }
 0x4ab   :  { %v523_v2 = vpop.permute.xlu1 %522 }
 0x4ac   :  { %v525_v3 = vmul.f32 %v858_v1, %v523_v2 }
 0x4ae   :  { %527 = vrot.lane.b32.xlu1 %v525_v3, %s1096_s5 }
 0x520   :  { %v528_v6 = vpop.permute.xlu1 %527 }
 0x521   :  { %v530_v7 = vadd.f32 %v528_v6, %v520_v5 }
 0x523   :  { %859 = vtanh.f32 %v530_v7 }
 0x52d   :  { %v860_v14 = vpop.eup %859 }
 0x52e   :  { %533 = vrot.lane.b32.xlu0 %v860_v14, %s1103_s18 }
 0x532   :  { %337 = vrot.lane.b32.xlu0 %v1298_v34, %s1104_s4 }
 0x5a0   :  { %v534_v15 = vpop.permute.xlu0 %533 }
 0x5a1   :  { %v536_v16 = vmul.f32 %v858_v1, %v534_v15 }
 0x5a3   :  { %538 = vrot.lane.b32.xlu1 %v536_v16, %s1096_s5 }
 0x5a4   :  { %v338_v17 = vpop.permute.xlu0 %337 }
 0x5a5   :  { %340 = vst.msk [vmem:[#allocation17] sm:$0x3] %vm334_vm2, %v338_v17 }
 0x5a7   :  { %544 = vrot.lane.b32.xlu1 %v530_v7, %s1104_s4 }
 0x615   :  { %v539_v18 = vpop.permute.xlu1 %538 }
 0x616   :  { %542 = vst.msk [vmem:[#allocation15 + $0x2] sm:$0x3] %vm334_vm2, %v539_v18  ;;  %794 = vmatmul.mubr.msk.f32.vlgmr.msra.gmra.mrb[4].mxu0 %vm147_vm1, %v539_v18 }
 0x619   :  { %v545_v0 = vpop.permute.xlu1 %544 }
 0x61a   :  { %548 = vst.msk [vmem:[#allocation17 + $0x2] sm:$0x3] %vm334_vm2, %v545_v0 }
 0x61b   :  { %1018 = shalt.err (!%p1015_p7)
}
 0x61c   :  { %s1019_s0 = scalar_lea.hbm %s1383_s10, 64 }
 0x61d   :  { %p1020_p8 = scmp.ne.s32.totalorder %s1383_s10, %s1019_s0  ;;  %p1023_p9 = scmp.lt.u32.totalorder %s1019_s0, %s1383_s10 }
 0x61f   :  { %p1025_p10 = pnand %p1023_p9, %p1020_p8 }
 0x621   :  { %1028 = shalt.err (!%p1025_p10)
}
 0x622   :  { %654 = dma.vmem_to_hbm [thread:$0]  %s649_s28, 64, %s1383_s10, [#allocation16], %s1096_s5, %s1096_s5, %s1097_s29  }
 0x623   :  { %s1106_s23 = smov [#allocation17]  }
 0x624   :  { %s660_s24 = sshll.u32 %s1106_s23, 4  ;;  %s661_s24 = int_to_ptr.vmem [resolvable:$true] %s660_s24 }
 0x625   :  { %s1029_s3 = scalar_lea.vmem %s661_s24, 64  ;;  %p1034_p12 = scmp.lt.s32.totalorder %s661_s24, %s661_s24 }
 0x626   :  { %p1030_p11 = scmp.ne.s32.totalorder %s661_s24, %s1029_s3  ;;  %p1035_p13 = scmp.lt.s32.totalorder %s1029_s3, %s1029_s3 }
 0x628   :  { %p1036_p0 = por %p1035_p13, %p1034_p12 }
 0x62a   :  { %p1037_p1 = pnand %p1036_p0, %p1030_p11 }
 0x62c   :  { %1040 = shalt.err (!%p1037_p1)
}
 0x62d   :  { %s1041_s18 = scalar_lea.hbm %s1384_s11, 64 }
 0x62e   :  { %p1042_p2 = scmp.ne.s32.totalorder %s1384_s11, %s1041_s18  ;;  %p1045_p3 = scmp.lt.u32.totalorder %s1041_s18, %s1384_s11 }
 0x630   :  { %p1047_p4 = pnand %p1045_p3, %p1042_p2 }
 0x632   :  { %1050 = shalt.err (!%p1047_p4)
}
 0x633   :  { %666 = dma.vmem_to_hbm [thread:$0]  %s661_s24, 64, %s1384_s11, [#allocation16], %s1096_s5, %s1096_s5, %s1097_s29  }
 0x634   :  { %v712_v19 = vld [vmem:[%s1379_s6] ss:$0 sm:$0xff]  ;;  %s1107_s8 = smov [#allocation14]  }
 0x635   :  { %s639_s28 = sshll.u32 %s1107_s8, 4  ;;  %s640_s28 = int_to_ptr.vmem [resolvable:$true] %s639_s28 }
 0x636   :  { %s1051_s12 = scalar_lea.vmem %s640_s28, 32  ;;  %p1056_p6 = scmp.lt.s32.totalorder %s640_s28, %s640_s28 }
 0x637   :  { %p1052_p5 = scmp.ne.s32.totalorder %s640_s28, %s1051_s12  ;;  %p1057_p7 = scmp.lt.s32.totalorder %s1051_s12, %s1051_s12 }
 0x639   :  { %p1058_p8 = por %p1057_p7, %p1056_p6 }
 0x63b   :  { %p1059_p9 = pnand %p1058_p8, %p1052_p5 }
 0x6e9   :  { %v628_v20 = vpop.f32.mrb[4].mxu0 }
 0x6ea   :  { %v629_v21 = vadd.f32 %v712_v19, %v628_v20  ;;  %v795_v22 = vpop.f32.mrb[5].mxu0 }
 0x6ec   :  { %632 = vst [vmem:[#allocation14] sm:$0x3] %v629_v21 }
 0x6ed   :  { %1062 = shalt.err (!%p1059_p9)
}
 0x6ee   :  { %s1063_s5 = scalar_lea.hbm %s1382_s9, 32 }
 0x6ef   :  { %p1064_p10 = scmp.ne.s32.totalorder %s1382_s9, %s1063_s5  ;;  %p1067_p11 = scmp.lt.u32.totalorder %s1063_s5, %s1382_s9 }
 0x6f1   :  { %p1069_p12 = pnand %p1067_p11, %p1064_p10 }
 0x6f3   :  { %1072 = shalt.err (!%p1069_p12)
}
 0x6f4   :  { %642 = dma.vmem_to_hbm [thread:$0]  %s640_s28, 32, %s1382_s9, [#allocation6]  }
 0x6f5   :  { %1085 = dma.done.wait [#allocation6], 32  }
 0x6f6   :  { %1086 = vsyncadd [#allocation6], 4294967264 }
 0x6f7   :  { %1087 = dma.done.wait [#allocation16], 128  }
 0x6f8   :  { %1088 = vsyncadd [#allocation16], 4294967168 }
 0x6f9   :  { %676 = vsyncpa [#allocation5], 1 }
 0x6fa   :  { %677 = vsyncpa [#allocation10], 1 }
 0x6fb   :  { %678 = vsyncpa [#allocation13], 1 }
 0x6fc   :  { %679 = vsyncpa [#allocation6], 1 }
 0x6fd   :  { %680 = vsyncpa [#allocation16], 1 }
 0x6fe   :  { %681 = vsyncpa [#allocation7], 1 }
 0x6ff   :  { %682 = vsyncmov [#allocation3] }
 0x702   :  { %s683_s19 = vpop.sfrf %682 }
 0x703   :  { %p714_p13 = scmp.ne.s32.totalorder %s683_s19, 0 }
 0x705   :  { %687 = shalt.err (%p714_p13)  }
 0x706   :  { %689 = vsyncmov [#allocation3 + $0x1] }
 0x709   :  { %s690_s30 = vpop.sfrf %689 }
 0x70a   :  { %p715_p0 = scmp.ne.s32.totalorder %s690_s30, 0 }
 0x70c   :  { %694 = shalt.err (%p715_p0)  }

</bundles_post_ra>
